<compile_context>
chip_gen: v6e
topology: v6e:2x2x1
jax: 0.10.0
libtpu: 0.0.40
codegen_flags: <defaults>
</compile_context>

<pallas_src>
import functools

import jax
import jax.numpy as jnp
from jax.experimental import pallas as pl
from jax.experimental.pallas import tpu as pltpu


def _dynamic_pooling_kernel(x_ref, m_ref, w_ref, s_ref, *, n_iter):
    # x_ref: (Bt, N, D), m_ref: (Bt, N), w_ref: (Bt, N), s_ref: (Bt, D)
    x = x_ref[...].astype(jnp.float32)        # (Bt, N, D)
    m = m_ref[...].astype(jnp.float32)        # (Bt, N)   lane-dense mask
    xm = m[:, :, None] * x                    # (Bt, N, D) masked instances

    bt, n, d = x.shape
    b = jnp.zeros((bt, n), jnp.float32)       # routing logits, lane-dense
    s = jnp.zeros((bt, 1, d), jnp.float32)

    def softmax_n(z):
        # Stable softmax over the instance axis (axis=1) of a (Bt, N) tensor.
        zmax = jnp.max(z, axis=1, keepdims=True)
        e = jnp.exp(z - zmax)
        denom = jnp.sum(e, axis=1, keepdims=True)          # (Bt, 1)
        # Reciprocal of the tiny per-bag denominator on the EUP, then a
        # broadcast multiply (VALU) instead of Bt*N divides.
        return e * pl.reciprocal(denom, approx=True)

    # n_iter is a small static constant -> unrolled at trace time.
    for _ in range(n_iter):
        w = softmax_n(m * b)                                       # (Bt, N)
        # sigma = w^T @ x per bag: keep as VPU multiply + XLU reduce (not MXU).
        sigma = jnp.sum(w[:, :, None] * xm, axis=1, keepdims=True)  # (Bt, 1, D)
        # Squash: scale = |sigma|^2 / (1 + |sigma|^2) / (|sigma| + 1e-8)
        nrm2 = jnp.sum(sigma * sigma, axis=2, keepdims=True)        # (Bt, 1, 1)
        nrm = jnp.sqrt(nrm2)
        scale = nrm2 * pl.reciprocal((1.0 + nrm2) * (nrm + 1e-8), approx=True)
        s = scale * sigma                                           # (Bt, 1, D)
        # Agreement update: b += sum_D(s * x)   (lane-axis reduce -> (Bt, N))
        b = b + jnp.sum(s * xm, axis=2)

    w_ref[...] = softmax_n(b).astype(w_ref.dtype)   # (Bt, N) lane-dense store
    s_ref[...] = s[:, 0, :].astype(s_ref.dtype)     # (Bt, D) lane-dense store


def _choose_block_b(B, N, D, vmem_budget_bytes=16 * 1024 * 1024):
    """Pick how many bags to process per grid step."""
    # f32 bytes of double-buffered block data per bag (x dominates); body
    # temporaries (xm, products) roughly double this again, hence the
    # conservative budget relative to vmem_limit_bytes.
    per_bag = 4 * (2 * N * D + 4 * N + 2 * D)
    bt = max(1, vmem_budget_bytes // per_bag)
    if B <= 8 or bt < B:
        bt = min(bt, B)
    else:
        # Whole batch would fit: still split in two so both TensorCores get
        # work on multi-core parts (v7x). No effect on v5e/v6e correctness.
        bt = -(-B // 2)
    if bt < B:
        # Blocked batch dim sits on the sublane axis of the 2-D blocks:
        # keep it a multiple of 8 to satisfy the (8, 128) tiling rule.
        bt = max(8, (bt // 8) * 8)
    return int(bt)


def dynamic_pooling(x, m, n_iter=3, block_b=None,
                    vmem_limit_bytes=48 * 1024 * 1024):
    """x: (B, N, D), m: (B, N, 1) or (B, N) -> (w: (B, N), s: (B, D))."""
    B, N, D = x.shape
    m2 = m[..., 0] if m.ndim == 3 else m            # lane-dense (B, N) mask
    assert m2.shape == (B, N)

    if block_b is None:
        block_b = _choose_block_b(B, N, D)

    # Pad the batch so it tiles evenly; padded bags are all-zero (no NaNs:
    # squash of a zero vector is zero) and are sliced off afterwards.
    Bp = pl.cdiv(B, block_b) * block_b
    if Bp != B:
        x = jnp.pad(x, ((0, Bp - B), (0, 0), (0, 0)))
        m2 = jnp.pad(m2, ((0, Bp - B), (0, 0)))

    kernel = functools.partial(_dynamic_pooling_kernel, n_iter=n_iter)
    w, s = pl.pallas_call(
        kernel,
        out_shape=(
            jax.ShapeDtypeStruct((Bp, N), x.dtype),
            jax.ShapeDtypeStruct((Bp, D), x.dtype),
        ),
        grid=(Bp // block_b,),
        in_specs=[
            pl.BlockSpec((block_b, N, D), lambda i: (i, 0, 0)),
            pl.BlockSpec((block_b, N), lambda i: (i, 0)),
        ],
        out_specs=(
            pl.BlockSpec((block_b, N), lambda i: (i, 0)),
            pl.BlockSpec((block_b, D), lambda i: (i, 0)),
        ),
        compiler_params=pltpu.CompilerParams(
            dimension_semantics=("parallel",),
            vmem_limit_bytes=vmem_limit_bytes,
        ),
    )(x, m2)
    if Bp != B:
        w, s = w[:B], s[:B]
    return w, s


def _reference(x, m, n_iter=3):
    # Pure-JAX mirror of the PyTorch forward, for verification.
    x = m * x
    b = jnp.zeros((x.shape[0], x.shape[1], 1), x.dtype)
    s = None
    for _ in range(n_iter):
        w = jax.nn.softmax(m * b, axis=1)          # (B, N, 1)
        w = jnp.swapaxes(w, 2, 1)                  # (B, 1, N)
        sigma = jnp.einsum("bij,bjk->bik", w, x)   # (B, 1, D)
        norm = jnp.linalg.norm(sigma, axis=2, keepdims=True)
        scale = norm ** 2 / (1 + norm ** 2) / (norm + 1e-8)
        s = scale * sigma                          # (B, 1, D)
        b_new = jnp.sum(s * x, axis=2)[..., None]  # (B, N, 1)
        b = b + b_new
    w = jax.nn.softmax(b, axis=1)
    return w[:, :, 0], s[:, 0, :]


if __name__ == "__main__":
    B, N, D = 4, 8, 32
    key = jax.random.PRNGKey(0)
    kx, km = jax.random.split(key)
    x = jax.random.normal(kx, (B, N, D), dtype=jnp.float32)
    # mask: mostly ones with a couple of zeroed instances
    m = (jax.random.uniform(km, (B, N, 1)) > 0.2).astype(jnp.float32)

    w, s = dynamic_pooling(x, m, n_iter=3)
    jax.block_until_ready((w, s))

    w_ref, s_ref = _reference(x, m, n_iter=3)
    assert w.shape == (B, N) and s.shape == (B, D)
    # Tolerance is relaxed because the kernel uses the EUP approximate
    # reciprocal (pl.reciprocal(approx=True)) inside the routing loop; flip
    # approx=False in the kernel for bit-tighter agreement with the reference.
    assert jnp.allclose(w, w_ref, atol=2e-2, rtol=2e-2)
    assert jnp.allclose(s, s_ref, atol=2e-2, rtol=2e-2)
    assert not jnp.any(jnp.isnan(w)) and not jnp.any(jnp.isnan(s))

    print("KERNEL_OK")
</pallas_src>

<mosaic_0001>
module attributes {stable_mosaic.version = 11 : i64} {
  func.func @_dynamic_pooling_kernel(%arg0: i32, %arg1: memref<4x8x32xf32, #tpu.memory_space<vmem>>, %arg2: memref<4x8xf32, #tpu.memory_space<vmem>>, %arg3: memref<4x8xf32, #tpu.memory_space<vmem>>, %arg4: memref<4x32xf32, #tpu.memory_space<vmem>>) attributes {dimension_semantics = [#tpu.dimension_semantics<parallel>], iteration_bounds = array<i64: 1>, scalar_prefetch = 0 : i64, scratch_operands = 0 : i64, tpu.core_type = #tpu.core_type<tc>, window_params = [{transform_indices = @transform_0, window_bounds = array<i64: 4, 8, 32>}, {transform_indices = @transform_1, window_bounds = array<i64: 4, 8>}, {transform_indices = @transform_2, window_bounds = array<i64: 4, 8>}, {transform_indices = @transform_3, window_bounds = array<i64: 4, 32>}]} {
    %c0 = arith.constant 0 : index
    %c0_0 = arith.constant 0 : index
    %c0_1 = arith.constant 0 : index
    %0 = vector.load %arg1[%c0, %c0_0, %c0_1] : memref<4x8x32xf32, #tpu.memory_space<vmem>>, vector<4x8x32xf32>
    %c0_2 = arith.constant 0 : index
    %c0_3 = arith.constant 0 : index
    %1 = vector.load %arg2[%c0_2, %c0_3] : memref<4x8xf32, #tpu.memory_space<vmem>>, vector<4x8xf32>
    %2 = vector.shape_cast %1 : vector<4x8xf32> to vector<4x8x1xf32>
    %3 = vector.broadcast %2 : vector<4x8x1xf32> to vector<4x8x32xf32>
    %4 = arith.mulf %3, %0 : vector<4x8x32xf32>
    %cst = arith.constant 0.000000e+00 : f32
    %5 = vector.broadcast %cst : f32 to vector<4x8xf32>
    %6 = arith.mulf %1, %5 : vector<4x8xf32>
    %cst_4 = arith.constant dense<0xFF800000> : vector<4xf32>
    %7 = vector.multi_reduction <maximumf>, %6, %cst_4 [1] : vector<4x8xf32> to vector<4xf32>
    %8 = vector.shape_cast %7 : vector<4xf32> to vector<4x1xf32>
    %9 = vector.broadcast %8 : vector<4x1xf32> to vector<4x8xf32>
    %10 = arith.subf %6, %9 : vector<4x8xf32>
    %11 = math.exp %10 : vector<4x8xf32>
    %cst_5 = arith.constant dense<0.000000e+00> : vector<4xf32>
    %12 = vector.multi_reduction <add>, %11, %cst_5 [1] : vector<4x8xf32> to vector<4xf32>
    %13 = vector.shape_cast %12 : vector<4xf32> to vector<4x1xf32>
    %14 = tpu.reciprocal %13 {approx = true} : vector<4x1xf32> -> vector<4x1xf32>
    %15 = vector.broadcast %14 : vector<4x1xf32> to vector<4x8xf32>
    %16 = arith.mulf %11, %15 : vector<4x8xf32>
    %17 = vector.shape_cast %16 : vector<4x8xf32> to vector<4x8x1xf32>
    %18 = vector.broadcast %17 : vector<4x8x1xf32> to vector<4x8x32xf32>
    %19 = arith.mulf %18, %4 : vector<4x8x32xf32>
    %cst_6 = arith.constant dense<0.000000e+00> : vector<4x32xf32>
    %20 = vector.multi_reduction <add>, %19, %cst_6 [1] : vector<4x8x32xf32> to vector<4x32xf32>
    %21 = vector.shape_cast %20 : vector<4x32xf32> to vector<4x1x32xf32>
    %22 = arith.mulf %21, %21 : vector<4x1x32xf32>
    %cst_7 = arith.constant dense<0.000000e+00> : vector<4x1xf32>
    %23 = vector.multi_reduction <add>, %22, %cst_7 [2] : vector<4x1x32xf32> to vector<4x1xf32>
    %24 = vector.shape_cast %23 : vector<4x1xf32> to vector<4x1x1xf32>
    %25 = math.sqrt %24 : vector<4x1x1xf32>
    %cst_8 = arith.constant 1.000000e+00 : f32
    %26 = vector.broadcast %cst_8 : f32 to vector<4x1x1xf32>
    %27 = arith.addf %26, %24 : vector<4x1x1xf32>
    %cst_9 = arith.constant 9.99999993E-9 : f32
    %28 = vector.broadcast %cst_9 : f32 to vector<4x1x1xf32>
    %29 = arith.addf %25, %28 : vector<4x1x1xf32>
    %30 = arith.mulf %27, %29 : vector<4x1x1xf32>
    %31 = tpu.reciprocal %30 {approx = true} : vector<4x1x1xf32> -> vector<4x1x1xf32>
    %32 = arith.mulf %24, %31 : vector<4x1x1xf32>
    %33 = vector.broadcast %32 : vector<4x1x1xf32> to vector<4x1x32xf32>
    %34 = arith.mulf %33, %21 : vector<4x1x32xf32>
    %35 = vector.broadcast %34 : vector<4x1x32xf32> to vector<4x8x32xf32>
    %36 = arith.mulf %35, %4 : vector<4x8x32xf32>
    %cst_10 = arith.constant dense<0.000000e+00> : vector<4x8xf32>
    %37 = vector.multi_reduction <add>, %36, %cst_10 [2] : vector<4x8x32xf32> to vector<4x8xf32>
    %38 = arith.addf %5, %37 : vector<4x8xf32>
    %39 = arith.mulf %1, %38 : vector<4x8xf32>
    %cst_11 = arith.constant dense<0xFF800000> : vector<4xf32>
    %40 = vector.multi_reduction <maximumf>, %39, %cst_11 [1] : vector<4x8xf32> to vector<4xf32>
    %41 = vector.shape_cast %40 : vector<4xf32> to vector<4x1xf32>
    %42 = vector.broadcast %41 : vector<4x1xf32> to vector<4x8xf32>
    %43 = arith.subf %39, %42 : vector<4x8xf32>
    %44 = math.exp %43 : vector<4x8xf32>
    %cst_12 = arith.constant dense<0.000000e+00> : vector<4xf32>
    %45 = vector.multi_reduction <add>, %44, %cst_12 [1] : vector<4x8xf32> to vector<4xf32>
    %46 = vector.shape_cast %45 : vector<4xf32> to vector<4x1xf32>
    %47 = tpu.reciprocal %46 {approx = true} : vector<4x1xf32> -> vector<4x1xf32>
    %48 = vector.broadcast %47 : vector<4x1xf32> to vector<4x8xf32>
    %49 = arith.mulf %44, %48 : vector<4x8xf32>
    %50 = vector.shape_cast %49 : vector<4x8xf32> to vector<4x8x1xf32>
    %51 = vector.broadcast %50 : vector<4x8x1xf32> to vector<4x8x32xf32>
    %52 = arith.mulf %51, %4 : vector<4x8x32xf32>
    %cst_13 = arith.constant dense<0.000000e+00> : vector<4x32xf32>
    %53 = vector.multi_reduction <add>, %52, %cst_13 [1] : vector<4x8x32xf32> to vector<4x32xf32>
    %54 = vector.shape_cast %53 : vector<4x32xf32> to vector<4x1x32xf32>
    %55 = arith.mulf %54, %54 : vector<4x1x32xf32>
    %cst_14 = arith.constant dense<0.000000e+00> : vector<4x1xf32>
    %56 = vector.multi_reduction <add>, %55, %cst_14 [2] : vector<4x1x32xf32> to vector<4x1xf32>
    %57 = vector.shape_cast %56 : vector<4x1xf32> to vector<4x1x1xf32>
    %58 = math.sqrt %57 : vector<4x1x1xf32>
    %cst_15 = arith.constant 1.000000e+00 : f32
    %59 = vector.broadcast %cst_15 : f32 to vector<4x1x1xf32>
    %60 = arith.addf %59, %57 : vector<4x1x1xf32>
    %cst_16 = arith.constant 9.99999993E-9 : f32
    %61 = vector.broadcast %cst_16 : f32 to vector<4x1x1xf32>
    %62 = arith.addf %58, %61 : vector<4x1x1xf32>
    %63 = arith.mulf %60, %62 : vector<4x1x1xf32>
    %64 = tpu.reciprocal %63 {approx = true} : vector<4x1x1xf32> -> vector<4x1x1xf32>
    %65 = arith.mulf %57, %64 : vector<4x1x1xf32>
    %66 = vector.broadcast %65 : vector<4x1x1xf32> to vector<4x1x32xf32>
    %67 = arith.mulf %66, %54 : vector<4x1x32xf32>
    %68 = vector.broadcast %67 : vector<4x1x32xf32> to vector<4x8x32xf32>
    %69 = arith.mulf %68, %4 : vector<4x8x32xf32>
    %cst_17 = arith.constant dense<0.000000e+00> : vector<4x8xf32>
    %70 = vector.multi_reduction <add>, %69, %cst_17 [2] : vector<4x8x32xf32> to vector<4x8xf32>
    %71 = arith.addf %38, %70 : vector<4x8xf32>
    %72 = arith.mulf %1, %71 : vector<4x8xf32>
    %cst_18 = arith.constant dense<0xFF800000> : vector<4xf32>
    %73 = vector.multi_reduction <maximumf>, %72, %cst_18 [1] : vector<4x8xf32> to vector<4xf32>
    %74 = vector.shape_cast %73 : vector<4xf32> to vector<4x1xf32>
    %75 = vector.broadcast %74 : vector<4x1xf32> to vector<4x8xf32>
    %76 = arith.subf %72, %75 : vector<4x8xf32>
    %77 = math.exp %76 : vector<4x8xf32>
    %cst_19 = arith.constant dense<0.000000e+00> : vector<4xf32>
    %78 = vector.multi_reduction <add>, %77, %cst_19 [1] : vector<4x8xf32> to vector<4xf32>
    %79 = vector.shape_cast %78 : vector<4xf32> to vector<4x1xf32>
    %80 = tpu.reciprocal %79 {approx = true} : vector<4x1xf32> -> vector<4x1xf32>
    %81 = vector.broadcast %80 : vector<4x1xf32> to vector<4x8xf32>
    %82 = arith.mulf %77, %81 : vector<4x8xf32>
    %83 = vector.shape_cast %82 : vector<4x8xf32> to vector<4x8x1xf32>
    %84 = vector.broadcast %83 : vector<4x8x1xf32> to vector<4x8x32xf32>
    %85 = arith.mulf %84, %4 : vector<4x8x32xf32>
    %cst_20 = arith.constant dense<0.000000e+00> : vector<4x32xf32>
    %86 = vector.multi_reduction <add>, %85, %cst_20 [1] : vector<4x8x32xf32> to vector<4x32xf32>
    %87 = vector.shape_cast %86 : vector<4x32xf32> to vector<4x1x32xf32>
    %88 = arith.mulf %87, %87 : vector<4x1x32xf32>
    %cst_21 = arith.constant dense<0.000000e+00> : vector<4x1xf32>
    %89 = vector.multi_reduction <add>, %88, %cst_21 [2] : vector<4x1x32xf32> to vector<4x1xf32>
    %90 = vector.shape_cast %89 : vector<4x1xf32> to vector<4x1x1xf32>
    %91 = math.sqrt %90 : vector<4x1x1xf32>
    %cst_22 = arith.constant 1.000000e+00 : f32
    %92 = vector.broadcast %cst_22 : f32 to vector<4x1x1xf32>
    %93 = arith.addf %92, %90 : vector<4x1x1xf32>
    %cst_23 = arith.constant 9.99999993E-9 : f32
    %94 = vector.broadcast %cst_23 : f32 to vector<4x1x1xf32>
    %95 = arith.addf %91, %94 : vector<4x1x1xf32>
    %96 = arith.mulf %93, %95 : vector<4x1x1xf32>
    %97 = tpu.reciprocal %96 {approx = true} : vector<4x1x1xf32> -> vector<4x1x1xf32>
    %98 = arith.mulf %90, %97 : vector<4x1x1xf32>
    %99 = vector.broadcast %98 : vector<4x1x1xf32> to vector<4x1x32xf32>
    %100 = arith.mulf %99, %87 : vector<4x1x32xf32>
    %101 = vector.broadcast %100 : vector<4x1x32xf32> to vector<4x8x32xf32>
    %102 = arith.mulf %101, %4 : vector<4x8x32xf32>
    %cst_24 = arith.constant dense<0.000000e+00> : vector<4x8xf32>
    %103 = vector.multi_reduction <add>, %102, %cst_24 [2] : vector<4x8x32xf32> to vector<4x8xf32>
    %104 = arith.addf %71, %103 : vector<4x8xf32>
    %cst_25 = arith.constant dense<0xFF800000> : vector<4xf32>
    %105 = vector.multi_reduction <maximumf>, %104, %cst_25 [1] : vector<4x8xf32> to vector<4xf32>
    %106 = vector.shape_cast %105 : vector<4xf32> to vector<4x1xf32>
    %107 = vector.broadcast %106 : vector<4x1xf32> to vector<4x8xf32>
    %108 = arith.subf %104, %107 : vector<4x8xf32>
    %109 = math.exp %108 : vector<4x8xf32>
    %cst_26 = arith.constant dense<0.000000e+00> : vector<4xf32>
    %110 = vector.multi_reduction <add>, %109, %cst_26 [1] : vector<4x8xf32> to vector<4xf32>
    %111 = vector.shape_cast %110 : vector<4xf32> to vector<4x1xf32>
    %112 = tpu.reciprocal %111 {approx = true} : vector<4x1xf32> -> vector<4x1xf32>
    %113 = vector.broadcast %112 : vector<4x1xf32> to vector<4x8xf32>
    %114 = arith.mulf %109, %113 : vector<4x8xf32>
    %c0_27 = arith.constant 0 : index
    %c0_28 = arith.constant 0 : index
    %115 = vector.load %arg3[%c0_27, %c0_28] : memref<4x8xf32, #tpu.memory_space<vmem>>, vector<4x8xf32>
    tpu.vector_store %arg3[%c0_27, %c0_28], %114 {strides = array<i32>} : memref<4x8xf32, #tpu.memory_space<vmem>>, vector<4x8xf32>,
    %116 = vector.shape_cast %100 : vector<4x1x32xf32> to vector<4x32xf32>
    %c0_29 = arith.constant 0 : index
    %c0_30 = arith.constant 0 : index
    %117 = vector.load %arg4[%c0_29, %c0_30] : memref<4x32xf32, #tpu.memory_space<vmem>>, vector<4x32xf32>
    tpu.vector_store %arg4[%c0_29, %c0_30], %116 {strides = array<i32>} : memref<4x32xf32, #tpu.memory_space<vmem>>, vector<4x32xf32>,
    return
  }
  func.func @transform_0(%arg0: i32) -> (i32, i32, i32) {
    %c0_i32 = arith.constant 0 : i32
    %c0_i32_0 = arith.constant 0 : i32
    %c0_i32_1 = arith.constant 0 : i32
    return %arg0, %c0_i32, %c0_i32_0 : i32, i32, i32
  }
  func.func @transform_1(%arg0: i32) -> (i32, i32) {
    %c0_i32 = arith.constant 0 : i32
    %c0_i32_0 = arith.constant 0 : i32
    return %arg0, %c0_i32 : i32, i32
  }
  func.func @transform_2(%arg0: i32) -> (i32, i32) {
    %c0_i32 = arith.constant 0 : i32
    %c0_i32_0 = arith.constant 0 : i32
    return %arg0, %c0_i32 : i32, i32
  }
  func.func @transform_3(%arg0: i32) -> (i32, i32) {
    %c0_i32 = arith.constant 0 : i32
    %c0_i32_0 = arith.constant 0 : i32
    return %arg0, %c0_i32 : i32, i32
  }
}

</mosaic_0001>

<bundles_post_ra>
// kernel: tpu_custom_call.1
= control target key start
LH: loop header
LB: loop body
LE: loop exit
PB: predicated region body
PF: predicated region fallthrough
CT: control target
= control target key end

     0   :  { %9 = vsyncpa [#allocation3], 0  ;;  %s1281_s0 = inlined_call_operand.hbm [shape: f32[4,8,32], index: 0, kind: input, shape index: {}]   ;;  %s1282_s1 = inlined_call_operand.hbm [shape: f32[4,8], index: 1, kind: input, shape index: {}]   ;;  %s1283_s2 = inlined_call_operand.hbm [shape: f32[4,8], index: 2, kind: output, shape index: {0}]   ;;  %s1284_s3 = inlined_call_operand.hbm [shape: f32[4,32], index: 3, kind: output, shape index: {1}]  }
   0x1   :  { %10 = vsyncpa [#allocation6], 0 }
   0x2   :  { %11 = vsyncpa [#allocation4], 0 }
   0x3   :  { %12 = vsyncpa [#allocation9], 0  ;;  %s982_s12 = smov [#allocation2]  }
   0x4   :  { %s18_s13 = sshll.u32 %s982_s12, 4  ;;  %s19_s13 = int_to_ptr.vmem [resolvable:$true] %s18_s13 }
   0x5   :  { %s902_s14 = scalar_lea.vmem %s19_s13, 512  ;;  %p907_p1 = scmp.lt.s32.totalorder %s19_s13, %s19_s13 }
   0x6   :  { %p903_p0 = scmp.ne.s32.totalorder %s19_s13, %s902_s14  ;;  %p908_p2 = scmp.lt.s32.totalorder %s902_s14, %s902_s14 }
   0x8   :  { %p909_p3 = por %p908_p2, %p907_p1 }
   0xa   :  { %p910_p4 = pnand %p909_p3, %p903_p0 }
   0xc   :  { %913 = shalt.err (!%p910_p4)
}
   0xd   :  { %s983_s15 = smov 128   ;;  %s984_s16 = smov 8  }
   0xe   :  { %24 = dma.hbm_to_vmem [thread:$0]  %s1281_s0, 512, %s19_s13, [#allocation3], %s983_s15, %s983_s15, %s984_s16  }
   0xf   :  { %s985_s19 = smov [#allocation5]  }
  0x10   :  { %s31_s20 = sshll.u32 %s985_s19, 4  ;;  %s32_s20 = int_to_ptr.vmem [resolvable:$true] %s31_s20 }
  0x11   :  { %s922_s21 = scalar_lea.vmem %s32_s20, 64  ;;  %p927_p6 = scmp.lt.s32.totalorder %s32_s20, %s32_s20 }
  0x12   :  { %p923_p5 = scmp.ne.s32.totalorder %s32_s20, %s922_s21  ;;  %p928_p7 = scmp.lt.s32.totalorder %s922_s21, %s922_s21 }
  0x14   :  { %p929_p8 = por %p928_p7, %p927_p6 }
  0x16   :  { %p930_p9 = pnand %p929_p8, %p923_p5 }
  0x18   :  { %933 = shalt.err (!%p930_p9)
}
  0x19   :  { %34 = dma.hbm_to_vmem [thread:$0]  %s1282_s1, 64, %s32_s20, [#allocation6]  }
  0x1a   :  { %974 = dma.done.wait [#allocation3], 512  }
  0x1b   :  { %975 = vsyncadd [#allocation3], 4294966784 }
  0x1c   :  { %976 = dma.done.wait [#allocation6], 64  }
  0x1d   :  { %977 = vsyncadd [#allocation6], 4294967232  ;;  %v1015_v0 = vld [vmem:[#allocation5] sm:$0xf]  ;;  %vm79_vm0 = vcmask 60416   ;;  %v46_v8 = vlaneseq  ;;  %v42_v32 = vld [vmem:[#allocation2 + $0x8] sm:$0xff] }
  0x1e   :  { %v78_v1 = vmul.f32 0.0, %v1015_v0  ;;  %v41_v30 = vld [vmem:[#allocation2] sm:$0xff]  ;;  %vm123_vm1 = vcmask 261120   ;;  %v43_v36 = vld [vmem:[#allocation2 + $0x10] sm:$0xff]  ;;  %v44_v45 = vld [vmem:[#allocation2 + $0x18] sm:$0xff]  ;;  %vm262_vm10 = vcmask 1041409  }
  0x1f   :  { %v47_v9 = vshrl.u32 %v46_v8, 7  ;;  %v245_v10 = vand.u32 127, %v46_v8  ;;  %vm264_vm11 = vcmask 1042434   ;;  %vm266_vm12 = vcmask 1043459   ;;  %s987_s0 = smov [#allocation8]  }
  0x20   :  { %v80_v2 = vsel %vm79_vm0, %v78_v1, -inf  ;;  %s801_s1 = sshll.u32 %s987_s0, 4  ;;  %s802_s1 = int_to_ptr.vmem [resolvable:$true] %s801_s1 }
  0x21   :  { %81 = vmax.xlane.f32.xlu0 %v80_v2  ;;  %v1020_v11 = vsub.s32 0, %v47_v9  ;;  %v1022_v12 = vsub.s32 %v245_v10, %v47_v9  ;;  %v1024_v13 = vsub.s32 1, %v47_v9  ;;  %v1030_v16 = vsub.s32 3, %v47_v9  ;;  %s934_s24 = scalar_lea.vmem %s802_s1, 64  ;;  %p939_p11 = scmp.lt.s32.totalorder %s802_s1, %s802_s1 }
  0x22   :  { %v1034_v18 = vsub.s32 2, %v47_v9  ;;  %p935_p10 = scmp.ne.s32.totalorder %s802_s1, %s934_s24  ;;  %p940_p12 = scmp.lt.s32.totalorder %s934_s24, %s934_s24 }
  0x23   :  { %v49_v14 = vrot.slane %v1015_v0, %v1020_v11  ;;  %v56_v15 = vrot.slane %v1015_v0, %v1024_v13  ;;  %v70_v17 = vrot.slane %v1015_v0, %v1030_v16 }
  0x24   :  { %v63_v19 = vrot.slane %v1015_v0, %v1034_v18  ;;  %p941_p13 = por %p940_p12, %p939_p11 }
  0x25   :  { %51 = vbcast.lane.b32.xlu1 %v49_v14, 256 }
  0x26   :  { %p942_p0 = pnand %p941_p13, %p935_p10 }
  0x29   :  { %58 = vbcast.lane.b32.xlu1 %v56_v15, 256 }
  0x2d   :  { %72 = vbcast.lane.b32.xlu1 %v70_v17, 256 }
  0x97   :  { %v52_v27 = vpop.permute.xlu1 %51 }
  0x98   :  { %v1042_v31 = vmul.f32 %v52_v27, %v41_v30 }
  0x9b   :  { %v59_v28 = vpop.permute.xlu1 %58 }
  0x9c   :  { %v1045_v37 = vmul.f32 %v59_v28, %v42_v32 }
  0x9f   :  { %v73_v29 = vpop.permute.xlu1 %72 }
  0xa0   :  { %v1053_v52 = vmul.f32 %v73_v29, %v44_v45 }
  0xaa   :  { %v82_v3 = vpop.xlane.xlu0 %81 }
  0xab   :  { %v83_v4 = vsub.f32 %v78_v1, %v82_v3 }
  0xad   :  { %v84_v5 = vmul.f32 1.442695, %v83_v4 }
  0xaf   :  { %824 = vpow2.f32 %v84_v5 }
  0xbc   :  { %v825_v6 = vpop.eup %824 }
  0xbd   :  { %v86_v7 = vsel %vm79_vm0, %v825_v6, 0.0 }
  0xbe   :  { %87 = vadd.xlane.f32.xlu0 %v86_v7 }
  0xd4   :  { %65 = vbcast.lane.b32.xlu0 %v63_v19, 256 }
 0x147   :  { %v88_v20 = vpop.xlane.xlu0 %87 }
 0x148   :  { %826 = vrcp.f32 %v88_v20 }
 0x14b   :  { %v66_v35 = vpop.permute.xlu0 %65 }
 0x14c   :  { %v1049_v42 = vmul.f32 %v66_v35, %v43_v36 }
 0x155   :  { %v827_v21 = vpop.eup %826 }
 0x156   :  { %v90_v22 = vmul.f32 %v827_v21, %v825_v6 }
 0x158   :  { %v94_v23 = vrot.slane %v90_v22, %v1020_v11  ;;  %v101_v24 = vrot.slane %v90_v22, %v1024_v13  ;;  %v108_v25 = vrot.slane %v90_v22, %v1034_v18  ;;  %v115_v26 = vrot.slane %v90_v22, %v1030_v16 }
 0x15a   :  { %96 = vbcast.lane.b32.xlu1 %v94_v23, 256 }
 0x15e   :  { %103 = vbcast.lane.b32.xlu1 %v101_v24, 256 }
 0x162   :  { %110 = vbcast.lane.b32.xlu1 %v108_v25, 256 }
 0x166   :  { %117 = vbcast.lane.b32.xlu1 %v115_v26, 256 }
 0x1cc   :  { %v97_v33 = vpop.permute.xlu1 %96 }
 0x1cd   :  { %v119_v34 = vmul.f32 %v97_v33, %v1042_v31 }
 0x1cf   :  { %v124_v38 = vsel %vm123_vm1, %v119_v34, 0.0 }
 0x1d0   :  { %v125_v39 = vrot.slane %v124_v38, 4  ;;  %v104_v40 = vpop.permute.xlu1 %103 }
 0x1d1   :  { %v120_v41 = vmul.f32 %v104_v40, %v1045_v37 }
 0x1d2   :  { %v126_v43 = vadd.f32 %v125_v39, %v124_v38 }
 0x1d3   :  { %v131_v44 = vsel %vm123_vm1, %v120_v41, 0.0 }
 0x1d4   :  { %v127_v46 = vrot.slane %v126_v43, 2  ;;  %v132_v47 = vrot.slane %v131_v44, 4  ;;  %v111_v48 = vpop.permute.xlu1 %110 }
 0x1d5   :  { %v121_v49 = vmul.f32 %v111_v48, %v1049_v42 }
 0x1d6   :  { %v128_v50 = vadd.f32 %v127_v46, %v126_v43  ;;  %v133_v51 = vadd.f32 %v132_v47, %v131_v44 }
 0x1d7   :  { %v138_v53 = vsel %vm123_vm1, %v121_v49, 0.0 }
 0x1d8   :  { %v134_v54 = vrot.slane %v133_v51, 2  ;;  %v139_v55 = vrot.slane %v138_v53, 4  ;;  %v118_v56 = vpop.permute.xlu1 %117  ;;  %v129_v57 = vrot.slane %v128_v50, 1 }
 0x1d9   :  { %v122_v58 = vmul.f32 %v118_v56, %v1053_v52 }
 0x1da   :  { %v135_v59 = vadd.f32 %v134_v54, %v133_v51  ;;  %v140_v60 = vadd.f32 %v139_v55, %v138_v53  ;;  %v1057_v61 = vadd.f32 %v129_v57, %v128_v50 }
 0x1db   :  { %v145_v62 = vsel %vm123_vm1, %v122_v58, 0.0 }
 0x1dc   :  { %v141_v63 = vrot.slane %v140_v60, 2  ;;  %v146_v1 = vrot.slane %v145_v62, 4  ;;  %v152_v2 = vmul.f32 %v1057_v61, %v1057_v61  ;;  %v136_v3 = vrot.slane %v135_v59, 1 }
 0x1de   :  { %v142_v4 = vadd.f32 %v141_v63, %v140_v60  ;;  %v147_v5 = vadd.f32 %v146_v1, %v145_v62  ;;  %v156_v6 = vsel %vm123_vm1, %v152_v2, 0.0  ;;  %v1063_v7 = vadd.f32 %v136_v3, %v135_v59 }
 0x1df   :  { %157 = vadd.xlane.f32.xlu1 %v156_v6 }
 0x1e0   :  { %v148_v8 = vrot.slane %v147_v5, 2  ;;  %v153_v9 = vmul.f32 %v1063_v7, %v1063_v7  ;;  %v143_v10 = vrot.slane %v142_v4, 1 }
 0x1e2   :  { %v149_v14 = vadd.f32 %v148_v8, %v147_v5  ;;  %v159_v15 = vsel %vm123_vm1, %v153_v9, 0.0  ;;  %v1068_v17 = vadd.f32 %v143_v10, %v142_v4 }
 0x1e3   :  { %160 = vadd.xlane.f32.xlu0 %v159_v15 }
 0x1e4   :  { %v154_v19 = vmul.f32 %v1068_v17, %v1068_v17  ;;  %v150_v20 = vrot.slane %v149_v14, 1 }
 0x1e6   :  { %v162_v21 = vsel %vm123_vm1, %v154_v19, 0.0  ;;  %v1073_v22 = vadd.f32 %v150_v20, %v149_v14 }
 0x1e7   :  { %163 = vadd.xlane.f32.xlu0 %v162_v21 }
 0x1e8   :  { %v155_v23 = vmul.f32 %v1073_v22, %v1073_v22 }
 0x1ea   :  { %v165_v24 = vsel %vm123_vm1, %v155_v23, 0.0 }
 0x1eb   :  { %166 = vadd.xlane.f32.xlu1 %v165_v24 }
 0x268   :  { %v158_v25 = vpop.xlane.xlu1 %157 }
 0x269   :  { %828 = vrsqrt.f32 %v158_v25  ;;  %vm170_vm2 = vcmp.eq.f32.partialorder %v158_v25, inf  ;;  %v173_v32 = vand.u32 2147483648, %v158_v25  ;;  %vm172_vm3 = vcmp.eq.f32.partialorder %v158_v25, 0.0 }
 0x26a   :  { %v196_v36 = vadd.f32 1.0, %v158_v25 }
 0x26c   :  { %v161_v26 = vpop.xlane.xlu0 %160 }
 0x26d   :  { %830 = vrsqrt.f32 %v161_v26  ;;  %vm177_vm4 = vcmp.eq.f32.partialorder %v161_v26, inf  ;;  %v180_v40 = vand.u32 2147483648, %v161_v26  ;;  %vm179_vm5 = vcmp.eq.f32.partialorder %v161_v26, 0.0 }
 0x26e   :  { %v197_v46 = vadd.f32 1.0, %v161_v26 }
 0x270   :  { %v164_v27 = vpop.xlane.xlu0 %163 }
 0x271   :  { %832 = vrsqrt.f32 %v164_v27  ;;  %vm184_vm6 = vcmp.eq.f32.partialorder %v164_v27, inf  ;;  %v187_v49 = vand.u32 2147483648, %v164_v27  ;;  %vm186_vm7 = vcmp.eq.f32.partialorder %v164_v27, 0.0 }
 0x272   :  { %v198_v55 = vadd.f32 1.0, %v164_v27 }
 0x274   :  { %v1078_v28 = vpop.xlane.xlu1 %166 }
 0x275   :  { %834 = vrsqrt.f32 %v1078_v28  ;;  %vm191_vm8 = vcmp.eq.f32.partialorder %v1078_v28, inf  ;;  %v194_v58 = vand.u32 2147483648, %v1078_v28  ;;  %vm193_vm9 = vcmp.eq.f32.partialorder %v1078_v28, 0.0 }
 0x276   :  { %v829_v29 = vpop.eup %828  ;;  %v199_v63 = vadd.f32 1.0, %v1078_v28 }
 0x277   :  { %v169_v30 = vmul.f32 %v829_v29, %v158_v25 }
 0x279   :  { %v171_v33 = vsel %vm170_vm2, %v158_v25, %v169_v30 }
 0x27a   :  { %v831_v34 = vpop.eup %830  ;;  %v174_v35 = vsel %vm172_vm3, %v173_v32, %v171_v33 }
 0x27b   :  { %v200_v38 = vadd.f32 1e-08, %v174_v35  ;;  %v176_v39 = vmul.f32 %v831_v34, %v161_v26 }
 0x27d   :  { %v178_v41 = vsel %vm177_vm4, %v161_v26, %v176_v39  ;;  %v204_v43 = vmul.f32 %v200_v38, %v196_v36 }
 0x27e   :  { %v833_v44 = vpop.eup %832  ;;  %v181_v45 = vsel %vm179_vm5, %v180_v40, %v178_v41 }
 0x27f   :  { %v201_v47 = vadd.f32 1e-08, %v181_v45  ;;  %v183_v48 = vmul.f32 %v833_v44, %v164_v27  ;;  %836 = vrcp.f32 %v204_v43 }
 0x281   :  { %v185_v50 = vsel %vm184_vm6, %v164_v27, %v183_v48  ;;  %v205_v51 = vmul.f32 %v201_v47, %v197_v46 }
 0x282   :  { %v835_v53 = vpop.eup %834  ;;  %v188_v54 = vsel %vm186_vm7, %v187_v49, %v185_v50 }
 0x283   :  { %v202_v56 = vadd.f32 1e-08, %v188_v54  ;;  %v190_v57 = vmul.f32 %v835_v53, %v1078_v28  ;;  %838 = vrcp.f32 %v205_v51 }
 0x285   :  { %v192_v59 = vsel %vm191_vm8, %v1078_v28, %v190_v57  ;;  %v206_v60 = vmul.f32 %v202_v56, %v198_v55 }
 0x286   :  { %v195_v62 = vsel %vm193_vm9, %v194_v58, %v192_v59 }
 0x287   :  { %v203_v1 = vadd.f32 1e-08, %v195_v62  ;;  %840 = vrcp.f32 %v206_v60 }
 0x289   :  { %v207_v2 = vmul.f32 %v203_v1, %v199_v63 }
 0x28b   :  { %842 = vrcp.f32 %v207_v2 }
 0x28c   :  { %v837_v3 = vpop.eup %836 }
 0x28d   :  { %v212_v4 = vmul.f32 %v837_v3, %v158_v25 }
 0x28f   :  { %v216_v5 = vmul.f32 %v212_v4, %v1057_v61 }
 0x290   :  { %v839_v6 = vpop.eup %838 }
 0x291   :  { %v220_v8 = vmul.f32 %v216_v5, %v1042_v31  ;;  %v213_v9 = vmul.f32 %v839_v6, %v161_v26 }
 0x293   :  { %v224_v10 = vsel %vm123_vm1, %v220_v8, 0.0  ;;  %v217_v14 = vmul.f32 %v213_v9, %v1063_v7 }
 0x294   :  { %v841_v15 = vpop.eup %840  ;;  %225 = vadd.xlane.f32.xlu0 %v224_v10 }
 0x295   :  { %v221_v19 = vmul.f32 %v217_v14, %v1045_v37  ;;  %v214_v20 = vmul.f32 %v841_v15, %v164_v27 }
 0x297   :  { %v227_v21 = vsel %vm123_vm1, %v221_v19, 0.0  ;;  %v218_v23 = vmul.f32 %v214_v20, %v1068_v17 }
 0x298   :  { %v843_v24 = vpop.eup %842  ;;  %228 = vadd.xlane.f32.xlu1 %v227_v21 }
 0x299   :  { %v222_v61 = vmul.f32 %v218_v23, %v1049_v42  ;;  %v215_v25 = vmul.f32 %v843_v24, %v1078_v28 }
 0x29b   :  { %v230_v26 = vsel %vm123_vm1, %v222_v61, 0.0  ;;  %v219_v29 = vmul.f32 %v215_v25, %v1073_v22 }
 0x29c   :  { %231 = vadd.xlane.f32.xlu0 %v230_v26 }
 0x29d   :  { %v223_v7 = vmul.f32 %v219_v29, %v1053_v52 }
 0x29f   :  { %v233_v30 = vsel %vm123_vm1, %v223_v7, 0.0 }
 0x2a0   :  { %234 = vadd.xlane.f32.xlu1 %v233_v30 }
 0x31d   :  { %v1100_v27 = vpop.xlane.xlu0 %225 }
 0x31e   :  { %v249_v22 = vrot.slane %v1100_v27, %v1022_v12 }
 0x321   :  { %v1102_v32 = vpop.xlane.xlu1 %228 }
 0x322   :  { %v253_v33 = vrot.slane %v1102_v32, %v1022_v12 }
 0x324   :  { %v263_v35 = vsel %vm262_vm10, %v253_v33, %v249_v22 }
 0x325   :  { %v1104_v17 = vpop.xlane.xlu0 %231 }
 0x326   :  { %v257_v28 = vrot.slane %v1104_v17, %v1022_v12 }
 0x328   :  { %v265_v38 = vsel %vm264_vm11, %v257_v28, %v263_v35 }
 0x329   :  { %v1112_v34 = vpop.xlane.xlu1 %234 }
 0x32a   :  { %v261_v36 = vrot.slane %v1112_v34, %v1022_v12 }
 0x32c   :  { %v267_v39 = vsel %vm266_vm12, %v261_v36, %v265_v38 }
 0x32d   :  { %v269_v40 = vmul.f32 %v267_v39, %v1015_v0 }
 0x32f   :  { %v270_v41 = vsel %vm79_vm0, %v269_v40, -inf }
 0x330   :  { %271 = vmax.xlane.f32.xlu0 %v270_v41 }
 0x3b9   :  { %v272_v43 = vpop.xlane.xlu0 %271 }
 0x3ba   :  { %v273_v44 = vsub.f32 %v269_v40, %v272_v43 }
 0x3bc   :  { %v274_v45 = vmul.f32 1.442695, %v273_v44 }
 0x3be   :  { %844 = vpow2.f32 %v274_v45 }
 0x3cb   :  { %v845_v46 = vpop.eup %844 }
 0x3cc   :  { %v276_v47 = vsel %vm79_vm0, %v845_v46, 0.0 }
 0x3cd   :  { %277 = vadd.xlane.f32.xlu1 %v276_v47 }
 0x456   :  { %v278_v48 = vpop.xlane.xlu1 %277 }
 0x457   :  { %846 = vrcp.f32 %v278_v48 }
 0x464   :  { %v847_v49 = vpop.eup %846 }
 0x465   :  { %v280_v50 = vmul.f32 %v847_v49, %v845_v46 }
 0x467   :  { %v291_v51 = vrot.slane %v280_v50, %v1024_v13  ;;  %v284_v53 = vrot.slane %v280_v50, %v1020_v11  ;;  %v298_v54 = vrot.slane %v280_v50, %v1034_v18  ;;  %v305_v55 = vrot.slane %v280_v50, %v1030_v16 }
 0x469   :  { %293 = vbcast.lane.b32.xlu1 %v291_v51, 256  ;;  %286 = vbcast.lane.b32.xlu0 %v284_v53, 256 }
 0x46d   :  { %300 = vbcast.lane.b32.xlu1 %v298_v54, 256  ;;  %307 = vbcast.lane.b32.xlu0 %v305_v55, 256 }
 0x4db   :  { %v294_v56 = vpop.permute.xlu1 %293  ;;  %v287_v57 = vpop.permute.xlu0 %286 }
 0x4dc   :  { %v310_v58 = vmul.f32 %v294_v56, %v1045_v37  ;;  %v309_v59 = vmul.f32 %v287_v57, %v1042_v31 }
 0x4de   :  { %v320_v60 = vsel %vm123_vm1, %v310_v58, 0.0  ;;  %v313_v62 = vsel %vm123_vm1, %v309_v59, 0.0 }
 0x4df   :  { %v321_v63 = vrot.slane %v320_v60, 4  ;;  %v314_v1 = vrot.slane %v313_v62, 4  ;;  %v301_v2 = vpop.permute.xlu1 %300  ;;  %v308_v3 = vpop.permute.xlu0 %307 }
 0x4e0   :  { %v311_v4 = vmul.f32 %v301_v2, %v1049_v42  ;;  %v312_v5 = vmul.f32 %v308_v3, %v1053_v52 }
 0x4e1   :  { %v322_v6 = vadd.f32 %v321_v63, %v320_v60  ;;  %v315_v8 = vadd.f32 %v314_v1, %v313_v62 }
 0x4e2   :  { %v327_v9 = vsel %vm123_vm1, %v311_v4, 0.0  ;;  %v334_v10 = vsel %vm123_vm1, %v312_v5, 0.0 }
 0x4e3   :  { %v323_v14 = vrot.slane %v322_v6, 2  ;;  %v316_v15 = vrot.slane %v315_v8, 2  ;;  %v328_v19 = vrot.slane %v327_v9, 4  ;;  %v335_v20 = vrot.slane %v334_v10, 4 }
 0x4e5   :  { %v324_v21 = vadd.f32 %v323_v14, %v322_v6  ;;  %v317_v23 = vadd.f32 %v316_v15, %v315_v8  ;;  %v329_v24 = vadd.f32 %v328_v19, %v327_v9  ;;  %v336_v61 = vadd.f32 %v335_v20, %v334_v10 }
 0x4e7   :  { %v330_v25 = vrot.slane %v329_v24, 2  ;;  %v337_v26 = vrot.slane %v336_v61, 2  ;;  %v325_v29 = vrot.slane %v324_v21, 1  ;;  %v318_v7 = vrot.slane %v317_v23, 1 }
 0x4e9   :  { %v331_v30 = vadd.f32 %v330_v25, %v329_v24  ;;  %v338_v33 = vadd.f32 %v337_v26, %v336_v61  ;;  %v1134_v28 = vadd.f32 %v325_v29, %v324_v21  ;;  %v1136_v22 = vadd.f32 %v318_v7, %v317_v23 }
 0x4eb   :  { %v342_v35 = vmul.f32 %v1134_v28, %v1134_v28  ;;  %v341_v36 = vmul.f32 %v1136_v22, %v1136_v22  ;;  %v332_v38 = vrot.slane %v331_v30, 1  ;;  %v339_v39 = vrot.slane %v338_v33, 1 }
 0x4ed   :  { %v348_v40 = vsel %vm123_vm1, %v342_v35, 0.0  ;;  %v345_v41 = vsel %vm123_vm1, %v341_v36, 0.0  ;;  %v1144_v43 = vadd.f32 %v332_v38, %v331_v30  ;;  %v1146_v44 = vadd.f32 %v339_v39, %v338_v33 }
 0x4ee   :  { %349 = vadd.xlane.f32.xlu0 %v348_v40  ;;  %346 = vadd.xlane.f32.xlu1 %v345_v41 }
 0x4ef   :  { %v343_v45 = vmul.f32 %v1144_v43, %v1144_v43  ;;  %v344_v46 = vmul.f32 %v1146_v44, %v1146_v44 }
 0x4f1   :  { %v351_v47 = vsel %vm123_vm1, %v343_v45, 0.0  ;;  %v354_v48 = vsel %vm123_vm1, %v344_v46, 0.0 }
 0x4f2   :  { %352 = vadd.xlane.f32.xlu0 %v351_v47  ;;  %355 = vadd.xlane.f32.xlu1 %v354_v48 }
 0x577   :  { %v347_v49 = vpop.xlane.xlu1 %346  ;;  %v350_v50 = vpop.xlane.xlu0 %349 }
 0x578   :  { %848 = vrsqrt.f32 %v347_v49  ;;  %vm359_vm13 = vcmp.eq.f32.partialorder %v347_v49, inf  ;;  %vm361_vm14 = vcmp.eq.f32.partialorder %v347_v49, 0.0  ;;  %v362_v57 = vand.u32 2147483648, %v347_v49 }
 0x579   :  { %850 = vrsqrt.f32 %v350_v50  ;;  %v385_v60 = vadd.f32 1.0, %v347_v49  ;;  %vm366_vm15 = vcmp.eq.f32.partialorder %v350_v50, inf  ;;  %v369_v62 = vand.u32 2147483648, %v350_v50 }
 0x57a   :  { %vm368_vm2 = vcmp.eq.f32.partialorder %v350_v50, 0.0  ;;  %v386_v3 = vadd.f32 1.0, %v350_v50 }
 0x57b   :  { %v356_v51 = vpop.xlane.xlu1 %355  ;;  %v353_v53 = vpop.xlane.xlu0 %352 }
 0x57c   :  { %852 = vrsqrt.f32 %v356_v51  ;;  %vm380_vm3 = vcmp.eq.f32.partialorder %v356_v51, inf  ;;  %vm382_vm4 = vcmp.eq.f32.partialorder %v356_v51, 0.0  ;;  %v383_v10 = vand.u32 2147483648, %v356_v51 }
 0x57d   :  { %854 = vrsqrt.f32 %v353_v53  ;;  %vm373_vm5 = vcmp.eq.f32.partialorder %v353_v53, inf  ;;  %v376_v19 = vand.u32 2147483648, %v353_v53  ;;  %vm375_vm6 = vcmp.eq.f32.partialorder %v353_v53, 0.0 }
 0x57e   :  { %v388_v61 = vadd.f32 1.0, %v356_v51  ;;  %v387_v29 = vadd.f32 1.0, %v353_v53 }
 0x585   :  { %v849_v54 = vpop.eup %848 }
 0x586   :  { %v851_v55 = vpop.eup %850  ;;  %v358_v56 = vmul.f32 %v849_v54, %v347_v49 }
 0x587   :  { %v365_v58 = vmul.f32 %v851_v55, %v350_v50 }
 0x588   :  { %v360_v59 = vsel %vm359_vm13, %v347_v49, %v358_v56 }
 0x589   :  { %v853_v63 = vpop.eup %852  ;;  %v363_v1 = vsel %vm361_vm14, %v362_v57, %v360_v59  ;;  %v367_v2 = vsel %vm366_vm15, %v350_v50, %v365_v58 }
 0x58a   :  { %v855_v4 = vpop.eup %854  ;;  %v389_v5 = vadd.f32 1e-08, %v363_v1  ;;  %v370_v6 = vsel %vm368_vm2, %v369_v62, %v367_v2  ;;  %v379_v8 = vmul.f32 %v853_v63, %v356_v51 }
 0x58b   :  { %v390_v9 = vadd.f32 1e-08, %v370_v6  ;;  %v372_v14 = vmul.f32 %v855_v4, %v353_v53 }
 0x58c   :  { %v381_v15 = vsel %vm380_vm3, %v356_v51, %v379_v8  ;;  %v393_v20 = vmul.f32 %v389_v5, %v385_v60 }
 0x58d   :  { %v384_v21 = vsel %vm382_vm4, %v383_v10, %v381_v15  ;;  %v374_v23 = vsel %vm373_vm5, %v353_v53, %v372_v14  ;;  %v394_v24 = vmul.f32 %v390_v9, %v386_v3  ;;  %vm783_vm4 = vcmask 257024  }
 0x58e   :  { %v392_v25 = vadd.f32 1e-08, %v384_v21  ;;  %v377_v26 = vsel %vm375_vm6, %v376_v19, %v374_v23  ;;  %856 = vrcp.f32 %v393_v20 }
 0x58f   :  { %v391_v7 = vadd.f32 1e-08, %v377_v26  ;;  %858 = vrcp.f32 %v394_v24 }
 0x590   :  { %v396_v30 = vmul.f32 %v392_v25, %v388_v61 }
 0x591   :  { %v395_v33 = vmul.f32 %v391_v7, %v387_v29 }
 0x592   :  { %860 = vrcp.f32 %v396_v30 }
 0x593   :  { %862 = vrcp.f32 %v395_v33 }
 0x59b   :  { %v857_v35 = vpop.eup %856 }
 0x59c   :  { %v859_v36 = vpop.eup %858  ;;  %v401_v38 = vmul.f32 %v857_v35, %v347_v49 }
 0x59d   :  { %v402_v39 = vmul.f32 %v859_v36, %v350_v50 }
 0x59e   :  { %v405_v40 = vmul.f32 %v401_v38, %v1136_v22 }
 0x59f   :  { %v861_v41 = vpop.eup %860  ;;  %v406_v45 = vmul.f32 %v402_v39, %v1134_v28 }
 0x5a0   :  { %v863_v46 = vpop.eup %862  ;;  %v409_v47 = vmul.f32 %v405_v40, %v1042_v31  ;;  %v404_v48 = vmul.f32 %v861_v41, %v356_v51 }
 0x5a1   :  { %v410_v54 = vmul.f32 %v406_v45, %v1045_v37  ;;  %v403_v55 = vmul.f32 %v863_v46, %v353_v53 }
 0x5a2   :  { %v413_v56 = vsel %vm123_vm1, %v409_v47, 0.0  ;;  %v408_v57 = vmul.f32 %v404_v48, %v1146_v44 }
 0x5a3   :  { %414 = vadd.xlane.f32.xlu0 %v413_v56  ;;  %v416_v49 = vsel %vm123_vm1, %v410_v54, 0.0  ;;  %v407_v50 = vmul.f32 %v403_v55, %v1144_v43 }
 0x5a4   :  { %417 = vadd.xlane.f32.xlu1 %v416_v49  ;;  %v412_v22 = vmul.f32 %v408_v57, %v1053_v52 }
 0x5a5   :  { %v411_v28 = vmul.f32 %v407_v50, %v1049_v42 }
 0x5a6   :  { %v422_v58 = vsel %vm123_vm1, %v412_v22, 0.0 }
 0x5a7   :  { %v419_v51 = vsel %vm123_vm1, %v411_v28, 0.0 }
 0x5a8   :  { %423 = vadd.xlane.f32.xlu1 %v422_v58  ;;  %420 = vadd.xlane.f32.xlu0 %v419_v51 }
 0x62c   :  { %v415_v53 = vpop.xlane.xlu0 %414 }
 0x62d   :  { %v418_v59 = vpop.xlane.xlu1 %417  ;;  %v1167_v44 = vadd.f32 %v415_v53, %v1100_v27 }
 0x62e   :  { %v1170_v60 = vadd.f32 %v418_v59, %v1102_v32 }
 0x62f   :  { %v436_v62 = vrot.slane %v1167_v44, %v1022_v12 }
 0x630   :  { %v440_v43 = vrot.slane %v1170_v60, %v1022_v12 }
 0x631   :  { %v424_v63 = vpop.xlane.xlu1 %423  ;;  %v421_v1 = vpop.xlane.xlu0 %420 }
 0x632   :  { %v1177_v2 = vadd.f32 %v424_v63, %v1112_v34  ;;  %v1180_v3 = vadd.f32 %v421_v1, %v1104_v17  ;;  %v449_v4 = vsel %vm262_vm10, %v440_v43, %v436_v62 }
 0x634   :  { %v448_v27 = vrot.slane %v1177_v2, %v1022_v12  ;;  %v444_v32 = vrot.slane %v1180_v3, %v1022_v12 }
 0x636   :  { %v450_v5 = vsel %vm264_vm11, %v444_v32, %v449_v4 }
 0x637   :  { %v451_v6 = vsel %vm266_vm12, %v448_v27, %v450_v5 }
 0x638   :  { %v453_v8 = vmul.f32 %v451_v6, %v1015_v0 }
 0x63a   :  { %v454_v34 = vsel %vm79_vm0, %v453_v8, -inf }
 0x63b   :  { %455 = vmax.xlane.f32.xlu0 %v454_v34 }
 0x6c4   :  { %v456_v9 = vpop.xlane.xlu0 %455 }
 0x6c5   :  { %v457_v17 = vsub.f32 %v453_v8, %v456_v9 }
 0x6c7   :  { %v458_v10 = vmul.f32 1.442695, %v457_v17 }
 0x6c9   :  { %864 = vpow2.f32 %v458_v10 }
 0x6d6   :  { %v865_v14 = vpop.eup %864 }
 0x6d7   :  { %v460_v15 = vsel %vm79_vm0, %v865_v14, 0.0 }
 0x6d8   :  { %461 = vadd.xlane.f32.xlu1 %v460_v15 }
 0x761   :  { %v462_v19 = vpop.xlane.xlu1 %461 }
 0x762   :  { %866 = vrcp.f32 %v462_v19 }
 0x76f   :  { %v867_v20 = vpop.eup %866 }
 0x770   :  { %v464_v21 = vmul.f32 %v867_v20, %v865_v14 }
 0x772   :  { %v475_v23 = vrot.slane %v464_v21, %v1024_v13  ;;  %v468_v24 = vrot.slane %v464_v21, %v1020_v11  ;;  %v482_v0 = vrot.slane %v464_v21, %v1034_v18  ;;  %v489_v61 = vrot.slane %v464_v21, %v1030_v16 }
 0x774   :  { %477 = vbcast.lane.b32.xlu1 %v475_v23, 256  ;;  %470 = vbcast.lane.b32.xlu0 %v468_v24, 256 }
 0x778   :  { %484 = vbcast.lane.b32.xlu1 %v482_v0, 256  ;;  %491 = vbcast.lane.b32.xlu0 %v489_v61, 256 }
 0x7e6   :  { %v478_v25 = vpop.permute.xlu1 %477  ;;  %v471_v26 = vpop.permute.xlu0 %470 }
 0x7e7   :  { %v494_v29 = vmul.f32 %v478_v25, %v1045_v37  ;;  %v493_v7 = vmul.f32 %v471_v26, %v1042_v31 }
 0x7e9   :  { %v504_v30 = vsel %vm123_vm1, %v494_v29, 0.0  ;;  %v497_v33 = vsel %vm123_vm1, %v493_v7, 0.0 }
 0x7ea   :  { %v505_v35 = vrot.slane %v504_v30, 4  ;;  %v498_v36 = vrot.slane %v497_v33, 4  ;;  %v485_v38 = vpop.permute.xlu1 %484  ;;  %v492_v39 = vpop.permute.xlu0 %491 }
 0x7eb   :  { %v495_v40 = vmul.f32 %v485_v38, %v1049_v42  ;;  %v496_v41 = vmul.f32 %v492_v39, %v1053_v52 }
 0x7ec   :  { %v506_v45 = vadd.f32 %v505_v35, %v504_v30  ;;  %v499_v46 = vadd.f32 %v498_v36, %v497_v33 }
 0x7ed   :  { %v511_v47 = vsel %vm123_vm1, %v495_v40, 0.0  ;;  %v518_v48 = vsel %vm123_vm1, %v496_v41, 0.0 }
 0x7ee   :  { %v507_v54 = vrot.slane %v506_v45, 2  ;;  %v500_v55 = vrot.slane %v499_v46, 2  ;;  %v512_v56 = vrot.slane %v511_v47, 4  ;;  %v519_v57 = vrot.slane %v518_v48, 4 }
 0x7f0   :  { %v508_v49 = vadd.f32 %v507_v54, %v506_v45  ;;  %v501_v50 = vadd.f32 %v500_v55, %v499_v46  ;;  %v513_v22 = vadd.f32 %v512_v56, %v511_v47  ;;  %v520_v28 = vadd.f32 %v519_v57, %v518_v48 }
 0x7f2   :  { %v514_v58 = vrot.slane %v513_v22, 2  ;;  %v521_v51 = vrot.slane %v520_v28, 2  ;;  %v509_v53 = vrot.slane %v508_v49, 1  ;;  %v502_v59 = vrot.slane %v501_v50, 1 }
 0x7f4   :  { %v515_v43 = vadd.f32 %v514_v58, %v513_v22  ;;  %v522_v62 = vadd.f32 %v521_v51, %v520_v28  ;;  %v1204_v63 = vadd.f32 %v509_v53, %v508_v49  ;;  %v1206_v1 = vadd.f32 %v502_v59, %v501_v50 }
 0x7f6   :  { %v526_v27 = vmul.f32 %v1204_v63, %v1204_v63  ;;  %v525_v32 = vmul.f32 %v1206_v1, %v1206_v1  ;;  %v516_v4 = vrot.slane %v515_v43, 1  ;;  %v523_v5 = vrot.slane %v522_v62, 1 }
 0x7f8   :  { %v532_v6 = vsel %vm123_vm1, %v526_v27, 0.0  ;;  %v529_v8 = vsel %vm123_vm1, %v525_v32, 0.0  ;;  %v1214_v34 = vadd.f32 %v516_v4, %v515_v43  ;;  %v1216_v9 = vadd.f32 %v523_v5, %v522_v62 }
 0x7f9   :  { %533 = vadd.xlane.f32.xlu0 %v532_v6  ;;  %530 = vadd.xlane.f32.xlu1 %v529_v8 }
 0x7fa   :  { %v527_v17 = vmul.f32 %v1214_v34, %v1214_v34  ;;  %v528_v10 = vmul.f32 %v1216_v9, %v1216_v9 }
 0x7fc   :  { %v535_v14 = vsel %vm123_vm1, %v527_v17, 0.0  ;;  %v538_v15 = vsel %vm123_vm1, %v528_v10, 0.0 }
 0x7fd   :  { %536 = vadd.xlane.f32.xlu0 %v535_v14  ;;  %539 = vadd.xlane.f32.xlu1 %v538_v15 }
 0x882   :  { %v531_v19 = vpop.xlane.xlu1 %530  ;;  %v534_v20 = vpop.xlane.xlu0 %533 }
 0x883   :  { %868 = vrsqrt.f32 %v531_v19  ;;  %vm543_vm7 = vcmp.eq.f32.partialorder %v531_v19, inf  ;;  %vm545_vm8 = vcmp.eq.f32.partialorder %v531_v19, 0.0  ;;  %v546_v25 = vand.u32 2147483648, %v531_v19 }
 0x884   :  { %870 = vrsqrt.f32 %v534_v20  ;;  %v569_v7 = vadd.f32 1.0, %v531_v19  ;;  %vm550_vm9 = vcmp.eq.f32.partialorder %v534_v20, inf  ;;  %v553_v30 = vand.u32 2147483648, %v534_v20 }
 0x885   :  { %vm552_vm13 = vcmp.eq.f32.partialorder %v534_v20, 0.0  ;;  %v570_v38 = vadd.f32 1.0, %v534_v20 }
 0x886   :  { %v540_v21 = vpop.xlane.xlu1 %539  ;;  %v537_v23 = vpop.xlane.xlu0 %536 }
 0x887   :  { %872 = vrsqrt.f32 %v540_v21  ;;  %vm564_vm14 = vcmp.eq.f32.partialorder %v540_v21, inf  ;;  %vm566_vm15 = vcmp.eq.f32.partialorder %v540_v21, 0.0  ;;  %v567_v47 = vand.u32 2147483648, %v540_v21 }
 0x888   :  { %874 = vrsqrt.f32 %v537_v23  ;;  %vm557_vm2 = vcmp.eq.f32.partialorder %v537_v23, inf  ;;  %v560_v55 = vand.u32 2147483648, %v537_v23  ;;  %vm559_vm3 = vcmp.eq.f32.partialorder %v537_v23, 0.0 }
 0x889   :  { %v572_v22 = vadd.f32 1.0, %v540_v21  ;;  %v571_v51 = vadd.f32 1.0, %v537_v23 }
 0x890   :  { %v869_v24 = vpop.eup %868 }
 0x891   :  { %v871_v0 = vpop.eup %870  ;;  %v542_v61 = vmul.f32 %v869_v24, %v531_v19 }
 0x892   :  { %v549_v26 = vmul.f32 %v871_v0, %v534_v20 }
 0x893   :  { %v544_v29 = vsel %vm543_vm7, %v531_v19, %v542_v61 }
 0x894   :  { %v873_v33 = vpop.eup %872  ;;  %v547_v35 = vsel %vm545_vm8, %v546_v25, %v544_v29  ;;  %v551_v36 = vsel %vm550_vm9, %v534_v20, %v549_v26 }
 0x895   :  { %v875_v39 = vpop.eup %874  ;;  %v573_v40 = vadd.f32 1e-08, %v547_v35  ;;  %v554_v41 = vsel %vm552_vm13, %v553_v30, %v551_v36  ;;  %v563_v45 = vmul.f32 %v873_v33, %v540_v21 }
 0x896   :  { %v574_v46 = vadd.f32 1e-08, %v554_v41  ;;  %v556_v48 = vmul.f32 %v875_v39, %v537_v23  ;;  %v986_v41 = vmov 0  }
 0x897   :  { %v565_v54 = vsel %vm564_vm14, %v540_v21, %v563_v45  ;;  %v577_v56 = vmul.f32 %v573_v40, %v569_v7  ;;  %823 = vset.pattern.permute.xlu0 %v986_v41  ;;  %822 = vset.pattern.permute.xlu1 %v986_v41 }
 0x898   :  { %v568_v57 = vsel %vm566_vm15, %v567_v47, %v565_v54  ;;  %v558_v49 = vsel %vm557_vm2, %v537_v23, %v556_v48  ;;  %v578_v50 = vmul.f32 %v574_v46, %v570_v38 }
 0x899   :  { %v576_v28 = vadd.f32 1e-08, %v568_v57  ;;  %v561_v58 = vsel %vm559_vm3, %v560_v55, %v558_v49  ;;  %876 = vrcp.f32 %v577_v56 }
 0x89a   :  { %v575_v53 = vadd.f32 1e-08, %v561_v58  ;;  %878 = vrcp.f32 %v578_v50 }
 0x89b   :  { %v580_v59 = vmul.f32 %v576_v28, %v572_v22 }
 0x89c   :  { %v579_v43 = vmul.f32 %v575_v53, %v571_v51 }
 0x89d   :  { %880 = vrcp.f32 %v580_v59 }
 0x89e   :  { %882 = vrcp.f32 %v579_v43 }
 0x8a6   :  { %v877_v62 = vpop.eup %876 }
 0x8a7   :  { %v879_v27 = vpop.eup %878  ;;  %v585_v32 = vmul.f32 %v877_v62, %v531_v19 }
 0x8a8   :  { %v586_v4 = vmul.f32 %v879_v27, %v534_v20 }
 0x8a9   :  { %v589_v5 = vmul.f32 %v585_v32, %v1206_v1 }
 0x8aa   :  { %v881_v6 = vpop.eup %880  ;;  %v590_v8 = vmul.f32 %v586_v4, %v1204_v63 }
 0x8ab   :  { %v883_v17 = vpop.eup %882  ;;  %v593_v10 = vmul.f32 %v589_v5, %v1042_v31  ;;  %v588_v14 = vmul.f32 %v881_v6, %v540_v21 }
 0x8ac   :  { %v594_v15 = vmul.f32 %v590_v8, %v1045_v37  ;;  %v587_v24 = vmul.f32 %v883_v17, %v537_v23  ;;  %v779_v63 = vsel %vm262_vm10, %v590_v8, %v589_v5 }
 0x8ad   :  { %v597_v0 = vsel %vm123_vm1, %v593_v10, 0.0  ;;  %v592_v61 = vmul.f32 %v588_v14, %v1216_v9 }
 0x8ae   :  { %598 = vadd.xlane.f32.xlu0 %v597_v0  ;;  %v600_v19 = vsel %vm123_vm1, %v594_v15, 0.0  ;;  %v591_v20 = vmul.f32 %v587_v24, %v1214_v34 }
 0x8af   :  { %601 = vadd.xlane.f32.xlu1 %v600_v19  ;;  %v596_v1 = vmul.f32 %v592_v61, %v1053_v52 }
 0x8b0   :  { %v595_v31 = vmul.f32 %v591_v20, %v1049_v42  ;;  %v780_v37 = vsel %vm264_vm11, %v591_v20, %v779_v63 }
 0x8b1   :  { %v606_v21 = vsel %vm123_vm1, %v596_v1, 0.0  ;;  %v781_v23 = vsel %vm266_vm12, %v592_v61, %v780_v37 }
 0x8b2   :  { %v603_v9 = vsel %vm123_vm1, %v595_v31, 0.0  ;;  %784 = vst.msk [vmem:[#allocation8] sm:$0xf] %vm783_vm4, %v781_v23 }
 0x8b3   :  { %607 = vadd.xlane.f32.xlu1 %v606_v21  ;;  %604 = vadd.xlane.f32.xlu0 %v603_v9 }
 0x937   :  { %v599_v34 = vpop.xlane.xlu0 %598 }
 0x938   :  { %v602_v25 = vpop.xlane.xlu1 %601  ;;  %v609_v52 = vadd.f32 %v599_v34, %v1167_v44 }
 0x939   :  { %v610_v26 = vadd.f32 %v602_v25, %v1170_v60 }
 0x93a   :  { %v620_v42 = vrot.slane %v609_v52, %v1022_v12 }
 0x93b   :  { %v624_v29 = vrot.slane %v610_v26, %v1022_v12 }
 0x93c   :  { %v608_v7 = vpop.xlane.xlu1 %607  ;;  %v605_v30 = vpop.xlane.xlu0 %604 }
 0x93d   :  { %v612_v33 = vadd.f32 %v608_v7, %v1177_v2  ;;  %v611_v35 = vadd.f32 %v605_v30, %v1180_v3  ;;  %v633_v39 = vsel %vm262_vm10, %v624_v29, %v620_v42 }
 0x93f   :  { %v632_v36 = vrot.slane %v612_v33, %v1022_v12  ;;  %v628_v38 = vrot.slane %v611_v35, %v1022_v12 }
 0x941   :  { %v634_v44 = vsel %vm264_vm11, %v628_v38, %v633_v39 }
 0x942   :  { %v635_v60 = vsel %vm266_vm12, %v632_v36, %v634_v44 }
 0x943   :  { %v637_v40 = vsel %vm79_vm0, %v635_v60, -inf }
 0x944   :  { %638 = vmax.xlane.f32.xlu0 %v637_v40 }
 0x9cd   :  { %v639_v45 = vpop.xlane.xlu0 %638 }
 0x9ce   :  { %v644_v2 = vrot.slane %v639_v45, %v1020_v11  ;;  %v648_v3 = vrot.slane %v639_v45, %v1024_v13  ;;  %v652_v46 = vrot.slane %v639_v45, %v1034_v18  ;;  %v656_v47 = vrot.slane %v639_v45, %v1030_v16 }
 0x9d0   :  { %v661_v48 = vsub.f32 %v609_v52, %v644_v2  ;;  %v662_v54 = vsub.f32 %v610_v26, %v648_v3  ;;  %v663_v55 = vsub.f32 %v611_v35, %v652_v46  ;;  %v664_v49 = vsub.f32 %v612_v33, %v656_v47 }
 0x9d2   :  { %v665_v56 = vmul.f32 1.442695, %v661_v48  ;;  %v667_v57 = vmul.f32 1.442695, %v662_v54  ;;  %v669_v50 = vmul.f32 1.442695, %v663_v55 }
 0x9d3   :  { %v671_v22 = vmul.f32 1.442695, %v664_v49 }
 0x9d4   :  { %884 = vpow2.f32 %v665_v56 }
 0x9d5   :  { %886 = vpow2.f32 %v667_v57 }
 0x9d6   :  { %888 = vpow2.f32 %v669_v50 }
 0x9d7   :  { %890 = vpow2.f32 %v671_v22 }
 0x9e1   :  { %v885_v28 = vpop.eup %884 }
 0x9e2   :  { %v887_v58 = vpop.eup %886  ;;  %678 = vperm.xlu1 %822, %v885_v28  }
 0x9e3   :  { %681 = vperm.xlu0 %823, %v887_v58   ;;  %v889_v51 = vpop.eup %888 }
 0x9e4   :  { %v891_v53 = vpop.eup %890 }
 0x9e6   :  { %684 = vperm.xlu1 %822, %v889_v51  }
 0x9ea   :  { %687 = vperm.xlu1 %822, %v891_v53  }
 0xa5d   :  { %v679_v59 = vpop.permute.xlu1 %678 }
 0xa5e   :  { %v682_v43 = vpop.permute.xlu0 %681  ;;  %v692_v32 = vrot.slane %v679_v59, %v1022_v12 }
 0xa5f   :  { %v696_v27 = vrot.slane %v682_v43, %v1022_v12 }
 0xa61   :  { %v685_v62 = vpop.permute.xlu1 %684  ;;  %v705_v6 = vsel %vm262_vm10, %v696_v27, %v692_v32 }
 0xa62   :  { %v700_v4 = vrot.slane %v685_v62, %v1022_v12 }
 0xa64   :  { %v706_v17 = vsel %vm264_vm11, %v700_v4, %v705_v6 }
 0xa65   :  { %v688_v5 = vpop.permute.xlu1 %687 }
 0xa66   :  { %v704_v8 = vrot.slane %v688_v5, %v1022_v12 }
 0xa68   :  { %v707_v10 = vsel %vm266_vm12, %v704_v8, %v706_v17 }
 0xa69   :  { %v709_v14 = vsel %vm79_vm0, %v707_v10, 0.0 }
 0xa6a   :  { %710 = vadd.xlane.f32.xlu1 %v709_v14 }
 0xaf3   :  { %v711_v15 = vpop.xlane.xlu1 %710 }
 0xaf4   :  { %892 = vrcp.f32 %v711_v15 }
 0xb01   :  { %v893_v24 = vpop.eup %892 }
 0xb02   :  { %v717_v0 = vrot.slane %v893_v24, %v1020_v11  ;;  %v721_v19 = vrot.slane %v893_v24, %v1024_v13  ;;  %v725_v1 = vrot.slane %v893_v24, %v1034_v18  ;;  %v729_v31 = vrot.slane %v893_v24, %v1030_v16 }
 0xb04   :  { %v734_v61 = vmul.f32 %v885_v28, %v717_v0  ;;  %v735_v20 = vmul.f32 %v887_v58, %v721_v19  ;;  %v736_v63 = vmul.f32 %v889_v51, %v725_v1  ;;  %v737_v37 = vmul.f32 %v891_v53, %v729_v31 }
 0xb06   :  { %743 = vperm.xlu0 %823, %v734_v61  }
 0xb0a   :  { %746 = vperm.xlu0 %823, %v735_v20  }
 0xb0e   :  { %749 = vperm.xlu0 %823, %v736_v63  }
 0xb12   :  { %752 = vperm.xlu0 %823, %v737_v37  }
 0xb13   :  { %945 = shalt.err (!%p942_p0)
}
 0xb14   :  { %804 = dma.vmem_to_hbm [thread:$0]  %s802_s1, 64, %s1284_s3, [#allocation9]  }
 0xb15   :  { %s988_s27 = smov [#allocation7]  }
 0xb16   :  { %s791_s28 = sshll.u32 %s988_s27, 4  ;;  %s792_s28 = int_to_ptr.vmem [resolvable:$true] %s791_s28 }
 0xb17   :  { %s954_s3 = scalar_lea.vmem %s792_s28, 64  ;;  %p959_p2 = scmp.lt.s32.totalorder %s792_s28, %s792_s28 }
 0xb18   :  { %p955_p1 = scmp.ne.s32.totalorder %s792_s28, %s954_s3  ;;  %p960_p3 = scmp.lt.s32.totalorder %s954_s3, %s954_s3 }
 0xb1a   :  { %p961_p4 = por %p960_p3, %p959_p2 }
 0xb1c   :  { %p962_p5 = pnand %p961_p4, %p955_p1 }
 0xb81   :  { %v744_v11 = vpop.permute.xlu0 %743 }
 0xb82   :  { %v757_v23 = vrot.slane %v744_v11, %v1022_v12 }
 0xb85   :  { %v747_v13 = vpop.permute.xlu0 %746 }
 0xb86   :  { %v761_v18 = vrot.slane %v747_v13, %v1022_v12 }
 0xb88   :  { %v770_v34 = vsel %vm262_vm10, %v761_v18, %v757_v23 }
 0xb89   :  { %v750_v16 = vpop.permute.xlu0 %749 }
 0xb8a   :  { %v765_v21 = vrot.slane %v750_v16, %v1022_v12 }
 0xb8c   :  { %v771_v52 = vsel %vm264_vm11, %v765_v21, %v770_v34 }
 0xb8d   :  { %v753_v9 = vpop.permute.xlu0 %752 }
 0xb8e   :  { %v769_v25 = vrot.slane %v753_v9, %v1022_v12 }
 0xb90   :  { %v772_v26 = vsel %vm266_vm12, %v769_v25, %v771_v52 }
 0xb91   :  { %774 = vst.msk [vmem:[#allocation7] sm:$0xf] %vm79_vm0, %v772_v26 }
 0xb92   :  { %965 = shalt.err (!%p962_p5)
}
 0xb93   :  { %794 = dma.vmem_to_hbm [thread:$0]  %s792_s28, 64, %s1283_s2, [#allocation4]  }
 0xb94   :  { %978 = dma.done.wait [#allocation4], 64  }
 0xb95   :  { %979 = vsyncadd [#allocation4], 4294967232 }
 0xb96   :  { %980 = dma.done.wait [#allocation9], 64  }
 0xb97   :  { %981 = vsyncadd [#allocation9], 4294967232 }
 0xb98   :  { %811 = vsyncpa [#allocation3], 1 }
 0xb99   :  { %812 = vsyncpa [#allocation6], 1 }
 0xb9a   :  { %813 = vsyncpa [#allocation4], 1 }
 0xb9b   :  { %814 = vsyncpa [#allocation9], 1 }

</bundles_post_ra>
